<compile_context>
chip_gen: v6e
topology: v6e:2x2x1
jax: 0.10.0
libtpu: 0.0.40
codegen_flags: <defaults>
</compile_context>

<pallas_src>
import functools

import jax
import jax.numpy as jnp
from jax.experimental import pallas as pl
from jax.experimental.pallas import tpu as pltpu

# ---- model hyper-parameters (opt) ------------------------------------------
# dim_v == dim_hv and dim_q == dim_hq so that MutanFusion2d's .view() followed
# by MutanFusion's linear_v / linear_q is shape-consistent (as in the original
# usage of this module).
OPT = dict(
    dim_v=32, dim_q=32,
    dim_hv=32, dim_hq=32,
    dim_mm=64, R=3,
    dropout_v=0.5, dropout_q=0.5, dropout_hv=0.0, dropout_hq=0.0,
    activation_v="tanh", activation_q="tanh",
    activation_hv="tanh", activation_hq="tanh",
    activation_mm="tanh",
)

TN_MAX = 512  # max row tile per grid step (well under VMEM on v5e/v6e/v7x)


def _round_up(x, m):
    return ((x + m - 1) // m) * m


def _mutan_kernel(v_ref, q_ref,
                  wv_ref, bv_ref, wq_ref, bq_ref,
                  whv_ref, bhv_ref, whq_ref, bhq_ref,
                  o_ref, *, R, dim_mm):
    # visual / question embeddings: x = tanh(x @ W + b)
    x_v = jnp.tanh(
        jnp.dot(v_ref[...], wv_ref[...], preferred_element_type=jnp.float32)
        + bv_ref[...])
    x_q = jnp.tanh(
        jnp.dot(q_ref[...], wq_ref[...], preferred_element_type=jnp.float32)
        + bq_ref[...])

    # rank-fused second stage: one lane-dense (TN, R*dim_mm) matmul per branch
    # instead of R tiny (TN, dim_mm) matmuls.
    hv = jnp.tanh(
        jnp.dot(x_v, whv_ref[...], preferred_element_type=jnp.float32)
        + bhv_ref[...])
    hq = jnp.tanh(
        jnp.dot(x_q, whq_ref[...], preferred_element_type=jnp.float32)
        + bhq_ref[...])

    prod = hv * hq                                      # (TN, R*dim_mm)
    acc = prod[:, 0:dim_mm]                             # static lane slices
    for r in range(1, R):                               # R is tiny & static
        acc = acc + prod[:, r * dim_mm:(r + 1) * dim_mm]

    o_ref[...] = jnp.tanh(acc).astype(o_ref.dtype)


def mutan_fusion_2d(input_v, input_q, params, opt=OPT):
    B, W, dv = input_v.shape
    _, _, dq = input_q.shape
    # MutanFusion2d requires dim_v == dim_hv / dim_q == dim_hq for its view()
    # followed by linear_v / linear_q to be consistent.
    assert dv == opt["dim_v"] == opt["dim_hv"]
    assert dq == opt["dim_q"] == opt["dim_hq"]

    dim_hv, dim_hq = opt["dim_hv"], opt["dim_hq"]
    dim_mm, R = opt["dim_mm"], opt["R"]

    N = B * W
    TN = min(TN_MAX, _round_up(N, 8))       # sublane-aligned row tile
    N_pad = _round_up(N, TN)

    x_v = input_v.reshape(N, dv)
    x_q = input_q.reshape(N, dq)
    if N_pad != N:
        x_v = jnp.pad(x_v, ((0, N_pad - N), (0, 0)))
        x_q = jnp.pad(x_q, ((0, N_pad - N), (0, 0)))

    wv, bv, wq, bq, whv, bhv, whq, bhq = params

    # Wrapper-side (zero runtime cost inside the kernel) rank stacking:
    #   (R, dim_h, dim_mm) -> (dim_h, R*dim_mm), biases (R, dim_mm) -> (1, R*dim_mm)
    whv_s = jnp.transpose(whv, (1, 0, 2)).reshape(dim_hv, R * dim_mm)
    bhv_s = bhv.reshape(1, R * dim_mm)
    whq_s = jnp.transpose(whq, (1, 0, 2)).reshape(dim_hq, R * dim_mm)
    bhq_s = bhq.reshape(1, R * dim_mm)

    kernel = functools.partial(_mutan_kernel, R=R, dim_mm=dim_mm)

    full2d = lambda shape: pl.BlockSpec(shape, lambda i: (0, 0))

    out = pl.pallas_call(
        kernel,
        out_shape=jax.ShapeDtypeStruct((N_pad, dim_mm), jnp.float32),
        grid_spec=pltpu.PrefetchScalarGridSpec(
            num_scalar_prefetch=0,
            grid=(N_pad // TN,),
            in_specs=[
                pl.BlockSpec((TN, dv), lambda i: (i, 0)),     # x_v rows
                pl.BlockSpec((TN, dq), lambda i: (i, 0)),     # x_q rows
                full2d((dv, dim_hv)),                         # W_v
                full2d((1, dim_hv)),                          # b_v
                full2d((dq, dim_hq)),                         # W_q
                full2d((1, dim_hq)),                          # b_q
                full2d((dim_hv, R * dim_mm)),                 # W_hv stacked
                full2d((1, R * dim_mm)),                      # b_hv stacked
                full2d((dim_hq, R * dim_mm)),                 # W_hq stacked
                full2d((1, R * dim_mm)),                      # b_hq stacked
            ],
            out_specs=pl.BlockSpec((TN, dim_mm), lambda i: (i, 0)),
        ),
        compiler_params=pltpu.CompilerParams(
            dimension_semantics=("parallel",)),
    )(x_v, x_q, wv, bv, wq, bq, whv_s, bhv_s, whq_s, bhq_s)

    return out[:N].reshape(B, W, dim_mm)


def init_params(key, opt=OPT):
    """Deterministic PyTorch-style (uniform +/- 1/sqrt(fan_in)) init."""
    dv, dq = opt["dim_v"], opt["dim_q"]
    dhv, dhq, dmm, R = opt["dim_hv"], opt["dim_hq"], opt["dim_mm"], opt["R"]
    ks = jax.random.split(key, 8)

    def u(k, shape, fan_in):
        b = 1.0 / jnp.sqrt(fan_in)
        return jax.random.uniform(k, shape, jnp.float32, -b, b)

    wv = u(ks[0], (dv, dhv), dv)          # stored (in, out)
    bv = u(ks[1], (1, dhv), dv)
    wq = u(ks[2], (dq, dhq), dq)
    bq = u(ks[3], (1, dhq), dq)
    whv = u(ks[4], (R, dhv, dmm), dhv)    # stacked list_linear_hv
    bhv = u(ks[5], (R, dmm), dhv)
    whq = u(ks[6], (R, dhq, dmm), dhq)    # stacked list_linear_hq
    bhq = u(ks[7], (R, dmm), dhq)
    return (wv, bv, wq, bq, whv, bhv, whq, bhq)


def reference(input_v, input_q, params, opt=OPT):
    """Pure-JAX reference of MutanFusion2d.forward (eval mode)."""
    B, W, _ = input_v.shape
    wv, bv, wq, bq, whv, bhv, whq, bhq = params
    x_v = jnp.tanh(input_v.reshape(B * W, -1) @ wv + bv)
    x_q = jnp.tanh(input_q.reshape(B * W, -1) @ wq + bq)
    acc = 0.0
    for r in range(opt["R"]):
        x_hv = jnp.tanh(x_v @ whv[r] + bhv[r])
        x_hq = jnp.tanh(x_q @ whq[r] + bhq[r])
        acc = acc + x_hq * x_hv
    return jnp.tanh(acc).reshape(B, W, opt["dim_mm"])


if __name__ == "__main__":
    key = jax.random.PRNGKey(0)
    k_v, k_q, k_p = jax.random.split(key, 3)
    params = init_params(k_p)

    # primary small test (N divides the tile exactly)
    B, W = 2, 8
    input_v = jax.random.normal(k_v, (B, W, OPT["dim_v"]), jnp.float32)
    input_q = jax.random.normal(k_q, (B, W, OPT["dim_q"]), jnp.float32)

    out = mutan_fusion_2d(input_v, input_q, params)
    out = jax.block_until_ready(out)
    ref = reference(input_v, input_q, params)
    assert out.shape == (B, W, OPT["dim_mm"])
    assert jnp.allclose(out, ref, atol=1e-5, rtol=1e-5), "mismatch vs reference"

    # second test exercising the row-padding path (N not a multiple of the tile)
    B2, W2 = 3, 7
    iv2 = jax.random.normal(jax.random.PRNGKey(1), (B2, W2, OPT["dim_v"]), jnp.float32)
    iq2 = jax.random.normal(jax.random.PRNGKey(2), (B2, W2, OPT["dim_q"]), jnp.float32)
    out2 = jax.block_until_ready(mutan_fusion_2d(iv2, iq2, params))
    ref2 = reference(iv2, iq2, params)
    assert jnp.allclose(out2, ref2, atol=1e-5, rtol=1e-5), "mismatch vs reference (padded)"

    print("KERNEL_OK")
</pallas_src>

<mosaic_0001>
module attributes {stable_mosaic.version = 11 : i64} {
  func.func @_mutan_kernel(%arg0: i32, %arg1: memref<16x32xf32, #tpu.memory_space<vmem>>, %arg2: memref<16x32xf32, #tpu.memory_space<vmem>>, %arg3: memref<32x32xf32, #tpu.memory_space<vmem>>, %arg4: memref<1x32xf32, #tpu.memory_space<vmem>>, %arg5: memref<32x32xf32, #tpu.memory_space<vmem>>, %arg6: memref<1x32xf32, #tpu.memory_space<vmem>>, %arg7: memref<32x192xf32, #tpu.memory_space<vmem>>, %arg8: memref<1x192xf32, #tpu.memory_space<vmem>>, %arg9: memref<32x192xf32, #tpu.memory_space<vmem>>, %arg10: memref<1x192xf32, #tpu.memory_space<vmem>>, %arg11: memref<16x64xf32, #tpu.memory_space<vmem>>) attributes {dimension_semantics = [#tpu.dimension_semantics<parallel>], iteration_bounds = array<i64: 1>, scalar_prefetch = 0 : i64, scratch_operands = 0 : i64, tpu.core_type = #tpu.core_type<tc>, window_params = [{transform_indices = @transform_0, window_bounds = array<i64: 16, 32>}, {transform_indices = @transform_1, window_bounds = array<i64: 16, 32>}, {pipeline_mode = #tpu.pipeline_mode<synchronous>, transform_indices = @transform_2, window_bounds = array<i64: 32, 32>}, {pipeline_mode = #tpu.pipeline_mode<synchronous>, transform_indices = @transform_3, window_bounds = array<i64: 1, 32>}, {pipeline_mode = #tpu.pipeline_mode<synchronous>, transform_indices = @transform_4, window_bounds = array<i64: 32, 32>}, {pipeline_mode = #tpu.pipeline_mode<synchronous>, transform_indices = @transform_5, window_bounds = array<i64: 1, 32>}, {pipeline_mode = #tpu.pipeline_mode<synchronous>, transform_indices = @transform_6, window_bounds = array<i64: 32, 192>}, {pipeline_mode = #tpu.pipeline_mode<synchronous>, transform_indices = @transform_7, window_bounds = array<i64: 1, 192>}, {pipeline_mode = #tpu.pipeline_mode<synchronous>, transform_indices = @transform_8, window_bounds = array<i64: 32, 192>}, {pipeline_mode = #tpu.pipeline_mode<synchronous>, transform_indices = @transform_9, window_bounds = array<i64: 1, 192>}, {transform_indices = @transform_10, window_bounds = array<i64: 16, 64>}]} {
    %c0 = arith.constant 0 : index
    %c0_0 = arith.constant 0 : index
    %0 = vector.load %arg1[%c0, %c0_0] : memref<16x32xf32, #tpu.memory_space<vmem>>, vector<16x32xf32>
    %c0_1 = arith.constant 0 : index
    %c0_2 = arith.constant 0 : index
    %1 = vector.load %arg3[%c0_1, %c0_2] : memref<32x32xf32, #tpu.memory_space<vmem>>, vector<32x32xf32>
    %cst = arith.constant dense<0.000000e+00> : vector<16x32xf32>
    %2 = tpu.matmul %0, %1, %cst {dimension_numbers = #tpu.dot_dimension_numbers<[1], [0], [0], [1], [0, 0, 1, 1], [], []>} : vector<16x32xf32>, vector<32x32xf32>, vector<16x32xf32> -> vector<16x32xf32>
    %c0_3 = arith.constant 0 : index
    %c0_4 = arith.constant 0 : index
    %3 = vector.load %arg4[%c0_3, %c0_4] : memref<1x32xf32, #tpu.memory_space<vmem>>, vector<1x32xf32>
    %4 = vector.broadcast %3 : vector<1x32xf32> to vector<16x32xf32>
    %5 = arith.addf %2, %4 : vector<16x32xf32>
    %6 = math.tanh %5 : vector<16x32xf32>
    %c0_5 = arith.constant 0 : index
    %c0_6 = arith.constant 0 : index
    %7 = vector.load %arg2[%c0_5, %c0_6] : memref<16x32xf32, #tpu.memory_space<vmem>>, vector<16x32xf32>
    %c0_7 = arith.constant 0 : index
    %c0_8 = arith.constant 0 : index
    %8 = vector.load %arg5[%c0_7, %c0_8] : memref<32x32xf32, #tpu.memory_space<vmem>>, vector<32x32xf32>
    %cst_9 = arith.constant dense<0.000000e+00> : vector<16x32xf32>
    %9 = tpu.matmul %7, %8, %cst_9 {dimension_numbers = #tpu.dot_dimension_numbers<[1], [0], [0], [1], [0, 0, 1, 1], [], []>} : vector<16x32xf32>, vector<32x32xf32>, vector<16x32xf32> -> vector<16x32xf32>
    %c0_10 = arith.constant 0 : index
    %c0_11 = arith.constant 0 : index
    %10 = vector.load %arg6[%c0_10, %c0_11] : memref<1x32xf32, #tpu.memory_space<vmem>>, vector<1x32xf32>
    %11 = vector.broadcast %10 : vector<1x32xf32> to vector<16x32xf32>
    %12 = arith.addf %9, %11 : vector<16x32xf32>
    %13 = math.tanh %12 : vector<16x32xf32>
    %c0_12 = arith.constant 0 : index
    %c0_13 = arith.constant 0 : index
    %14 = vector.load %arg7[%c0_12, %c0_13] : memref<32x192xf32, #tpu.memory_space<vmem>>, vector<32x192xf32>
    %cst_14 = arith.constant dense<0.000000e+00> : vector<16x192xf32>
    %15 = tpu.matmul %6, %14, %cst_14 {dimension_numbers = #tpu.dot_dimension_numbers<[1], [0], [0], [1], [0, 0, 1, 1], [], []>} : vector<16x32xf32>, vector<32x192xf32>, vector<16x192xf32> -> vector<16x192xf32>
    %c0_15 = arith.constant 0 : index
    %c0_16 = arith.constant 0 : index
    %16 = vector.load %arg8[%c0_15, %c0_16] : memref<1x192xf32, #tpu.memory_space<vmem>>, vector<1x192xf32>
    %17 = vector.broadcast %16 : vector<1x192xf32> to vector<16x192xf32>
    %18 = arith.addf %15, %17 : vector<16x192xf32>
    %19 = math.tanh %18 : vector<16x192xf32>
    %c0_17 = arith.constant 0 : index
    %c0_18 = arith.constant 0 : index
    %20 = vector.load %arg9[%c0_17, %c0_18] : memref<32x192xf32, #tpu.memory_space<vmem>>, vector<32x192xf32>
    %cst_19 = arith.constant dense<0.000000e+00> : vector<16x192xf32>
    %21 = tpu.matmul %13, %20, %cst_19 {dimension_numbers = #tpu.dot_dimension_numbers<[1], [0], [0], [1], [0, 0, 1, 1], [], []>} : vector<16x32xf32>, vector<32x192xf32>, vector<16x192xf32> -> vector<16x192xf32>
    %c0_20 = arith.constant 0 : index
    %c0_21 = arith.constant 0 : index
    %22 = vector.load %arg10[%c0_20, %c0_21] : memref<1x192xf32, #tpu.memory_space<vmem>>, vector<1x192xf32>
    %23 = vector.broadcast %22 : vector<1x192xf32> to vector<16x192xf32>
    %24 = arith.addf %21, %23 : vector<16x192xf32>
    %25 = math.tanh %24 : vector<16x192xf32>
    %26 = arith.mulf %19, %25 : vector<16x192xf32>
    %27 = vector.extract_strided_slice %26 {offsets = [0, 0], sizes = [16, 64], strides = [1, 1]} : vector<16x192xf32> to vector<16x64xf32>
    %28 = vector.extract_strided_slice %26 {offsets = [0, 64], sizes = [16, 64], strides = [1, 1]} : vector<16x192xf32> to vector<16x64xf32>
    %29 = arith.addf %27, %28 : vector<16x64xf32>
    %30 = vector.extract_strided_slice %26 {offsets = [0, 128], sizes = [16, 64], strides = [1, 1]} : vector<16x192xf32> to vector<16x64xf32>
    %31 = arith.addf %29, %30 : vector<16x64xf32>
    %32 = math.tanh %31 : vector<16x64xf32>
    %c0_22 = arith.constant 0 : index
    %c0_23 = arith.constant 0 : index
    %33 = vector.load %arg11[%c0_22, %c0_23] : memref<16x64xf32, #tpu.memory_space<vmem>>, vector<16x64xf32>
    tpu.vector_store %arg11[%c0_22, %c0_23], %32 {strides = array<i32>} : memref<16x64xf32, #tpu.memory_space<vmem>>, vector<16x64xf32>,
    return
  }
  func.func @transform_0(%arg0: i32) -> (i32, i32) {
    %c0_i32 = arith.constant 0 : i32
    %c0_i32_0 = arith.constant 0 : i32
    return %arg0, %c0_i32 : i32, i32
  }
  func.func @transform_1(%arg0: i32) -> (i32, i32) {
    %c0_i32 = arith.constant 0 : i32
    %c0_i32_0 = arith.constant 0 : i32
    return %arg0, %c0_i32 : i32, i32
  }
  func.func @transform_2(%arg0: i32) -> (i32, i32) {
    %c0_i32 = arith.constant 0 : i32
    %c0_i32_0 = arith.constant 0 : i32
    %c0_i32_1 = arith.constant 0 : i32
    return %c0_i32, %c0_i32_0 : i32, i32
  }
  func.func @transform_3(%arg0: i32) -> (i32, i32) {
    %c0_i32 = arith.constant 0 : i32
    %c0_i32_0 = arith.constant 0 : i32
    %c0_i32_1 = arith.constant 0 : i32
    return %c0_i32, %c0_i32_0 : i32, i32
  }
  func.func @transform_4(%arg0: i32) -> (i32, i32) {
    %c0_i32 = arith.constant 0 : i32
    %c0_i32_0 = arith.constant 0 : i32
    %c0_i32_1 = arith.constant 0 : i32
    return %c0_i32, %c0_i32_0 : i32, i32
  }
  func.func @transform_5(%arg0: i32) -> (i32, i32) {
    %c0_i32 = arith.constant 0 : i32
    %c0_i32_0 = arith.constant 0 : i32
    %c0_i32_1 = arith.constant 0 : i32
    return %c0_i32, %c0_i32_0 : i32, i32
  }
  func.func @transform_6(%arg0: i32) -> (i32, i32) {
    %c0_i32 = arith.constant 0 : i32
    %c0_i32_0 = arith.constant 0 : i32
    %c0_i32_1 = arith.constant 0 : i32
    return %c0_i32, %c0_i32_0 : i32, i32
  }
  func.func @transform_7(%arg0: i32) -> (i32, i32) {
    %c0_i32 = arith.constant 0 : i32
    %c0_i32_0 = arith.constant 0 : i32
    %c0_i32_1 = arith.constant 0 : i32
    return %c0_i32, %c0_i32_0 : i32, i32
  }
  func.func @transform_8(%arg0: i32) -> (i32, i32) {
    %c0_i32 = arith.constant 0 : i32
    %c0_i32_0 = arith.constant 0 : i32
    %c0_i32_1 = arith.constant 0 : i32
    return %c0_i32, %c0_i32_0 : i32, i32
  }
  func.func @transform_9(%arg0: i32) -> (i32, i32) {
    %c0_i32 = arith.constant 0 : i32
    %c0_i32_0 = arith.constant 0 : i32
    %c0_i32_1 = arith.constant 0 : i32
    return %c0_i32, %c0_i32_0 : i32, i32
  }
  func.func @transform_10(%arg0: i32) -> (i32, i32) {
    %c0_i32 = arith.constant 0 : i32
    %c0_i32_0 = arith.constant 0 : i32
    return %arg0, %c0_i32 : i32, i32
  }
}

</mosaic_0001>

<bundles_post_ra>
// kernel: tpu_custom_call.1
= control target key start
LH: loop header
LB: loop body
LE: loop exit
PB: predicated region body
PF: predicated region fallthrough
CT: control target
= control target key end

     0   :  { %15 = vsyncpa [#allocation3], 0  ;;  %s925_s0 = inlined_call_operand.hbm [shape: f32[16,32], index: 0, kind: input, shape index: {}]   ;;  %s926_s1 = inlined_call_operand.hbm [shape: f32[16,32], index: 1, kind: input, shape index: {}]   ;;  %s927_s2 = inlined_call_operand.hbm [shape: f32[32,32], index: 2, kind: input, shape index: {}]   ;;  %s928_s3 = inlined_call_operand.vmem [shape: f32[1,32], index: 3, kind: input, shape index: {}]   ;;  %s929_s4 = inlined_call_operand.hbm [shape: f32[32,32], index: 4, kind: input, shape index: {}]   ;;  %s930_s5 = inlined_call_operand.vmem [shape: f32[1,32], index: 5, kind: input, shape index: {}]   ;;  %s931_s6 = inlined_call_operand.hbm [shape: f32[32,192], index: 6, kind: input, shape index: {}]   ;;  %s932_s7 = inlined_call_operand.vmem [shape: f32[1,192], index: 7, kind: input, shape index: {}]   ;;  %s933_s8 = inlined_call_operand.hbm [shape: f32[32,192], index: 8, kind: input, shape index: {}]   ;;  %s934_s9 = inlined_call_operand.vmem [shape: f32[1,192], index: 9, kind: input, shape index: {}]   ;;  %s935_s10 = inlined_call_operand.hbm [shape: f32[16,64], index: 10, kind: output, shape index: {}]  }
   0x1   :  { %16 = vsyncpa [#allocation6], 0 }
   0x2   :  { %17 = vsyncpa [#allocation9], 0 }
   0x3   :  { %18 = vsyncpa [#allocation12], 0 }
   0x4   :  { %19 = vsyncpa [#allocation4], 0  ;;  %s801_s13 = smov [#allocation5]   ;;  %s802_s15 = smov [#allocation8]  }
   0x5   :  { %s37_s14 = sshll.u32 %s801_s13, 4  ;;  %s63_s16 = sshll.u32 %s802_s15, 4  ;;  %s38_s14 = int_to_ptr.vmem [resolvable:$true] %s37_s14  ;;  %s64_s16 = int_to_ptr.vmem [resolvable:$true] %s63_s16 }
   0x6   :  { %s659_s17 = scalar_lea.vmem %s38_s14, 256  ;;  %p664_p1 = scmp.lt.s32.totalorder %s38_s14, %s38_s14 }
   0x7   :  { %p660_p0 = scmp.ne.s32.totalorder %s38_s14, %s659_s17  ;;  %p665_p2 = scmp.lt.s32.totalorder %s659_s17, %s659_s17 }
   0x9   :  { %p666_p3 = por %p665_p2, %p664_p1 }
   0xb   :  { %p667_p4 = pnand %p666_p3, %p660_p0 }
   0xd   :  { %670 = shalt.err (!%p667_p4)
}
   0xe   :  { %s803_s18 = smov 128   ;;  %s804_s19 = smov 8  }
   0xf   :  { %43 = dma.hbm_to_vmem [thread:$0]  %s926_s1, 256, %s38_s14, [#allocation6], %s803_s18, %s803_s18, %s804_s19  }
  0x10   :  { %s679_s22 = scalar_lea.vmem %s64_s16, 512  ;;  %p684_p6 = scmp.lt.s32.totalorder %s64_s16, %s64_s16 }
  0x11   :  { %p680_p5 = scmp.ne.s32.totalorder %s64_s16, %s679_s22  ;;  %p685_p7 = scmp.lt.s32.totalorder %s679_s22, %s679_s22 }
  0x13   :  { %p686_p8 = por %p685_p7, %p684_p6 }
  0x15   :  { %p687_p9 = pnand %p686_p8, %p680_p5 }
  0x17   :  { %690 = shalt.err (!%p687_p9)
}
  0x18   :  { %69 = dma.hbm_to_vmem [thread:$0]  %s929_s4, 512, %s64_s16, [#allocation9], %s803_s18, %s803_s18, %s804_s19  }
  0x19   :  { %s805_s25 = smov [#allocation2]   ;;  %s806_s27 = smov [#allocation7]  }
  0x1a   :  { %s25_s26 = sshll.u32 %s805_s25, 4  ;;  %s49_s28 = sshll.u32 %s806_s27, 4  ;;  %s26_s26 = int_to_ptr.vmem [resolvable:$true] %s25_s26  ;;  %s50_s28 = int_to_ptr.vmem [resolvable:$true] %s49_s28 }
  0x1b   :  { %s699_s1 = scalar_lea.vmem %s26_s26, 256  ;;  %p704_p11 = scmp.lt.s32.totalorder %s26_s26, %s26_s26 }
  0x1c   :  { %p700_p10 = scmp.ne.s32.totalorder %s26_s26, %s699_s1  ;;  %p705_p12 = scmp.lt.s32.totalorder %s699_s1, %s699_s1 }
  0x1e   :  { %p706_p13 = por %p705_p12, %p704_p11 }
  0x20   :  { %p707_p0 = pnand %p706_p13, %p700_p10 }
  0x22   :  { %710 = shalt.err (!%p707_p0)
}
  0x23   :  { %31 = dma.hbm_to_vmem [thread:$0]  %s925_s0, 256, %s26_s26, [#allocation3], %s803_s18, %s803_s18, %s804_s19  }
  0x24   :  { %s719_s4 = scalar_lea.vmem %s50_s28, 512  ;;  %p724_p2 = scmp.lt.s32.totalorder %s50_s28, %s50_s28 }
  0x25   :  { %p720_p1 = scmp.ne.s32.totalorder %s50_s28, %s719_s4  ;;  %p725_p3 = scmp.lt.s32.totalorder %s719_s4, %s719_s4 }
  0x27   :  { %p726_p4 = por %p725_p3, %p724_p2 }
  0x29   :  { %p727_p5 = pnand %p726_p4, %p720_p1 }
  0x2b   :  { %730 = shalt.err (!%p727_p5)
}
  0x2c   :  { %55 = dma.hbm_to_vmem [thread:$0]  %s927_s2, 512, %s50_s28, [#allocation6], %s803_s18, %s803_s18, %s804_s19  }
  0x2d   :  { %s807_s13 = smov [#allocation10]  }
  0x2e   :  { %s77_s14 = sshll.u32 %s807_s13, 4  ;;  %s78_s14 = int_to_ptr.vmem [resolvable:$true] %s77_s14 }
  0x2f   :  { %s739_s15 = scalar_lea.vmem %s78_s14, 1024  ;;  %p744_p7 = scmp.lt.s32.totalorder %s78_s14, %s78_s14 }
  0x30   :  { %p740_p6 = scmp.ne.s32.totalorder %s78_s14, %s739_s15  ;;  %p745_p8 = scmp.lt.s32.totalorder %s739_s15, %s739_s15 }
  0x32   :  { %p746_p9 = por %p745_p8, %p744_p7 }
  0x34   :  { %p747_p10 = pnand %p746_p9, %p740_p6 }
  0x36   :  { %750 = shalt.err (!%p747_p10)
}
  0x37   :  { %s808_s0 = smov 256   ;;  %s809_s16 = smov 16  }
  0x38   :  { %83 = dma.hbm_to_vmem [thread:$0]  %s931_s6, 1024, %s78_s14, [#allocation9], %s808_s0, %s808_s0, %s809_s16  }
  0x39   :  { %s810_s21 = smov [#allocation11]  }
  0x3a   :  { %s91_s22 = sshll.u32 %s810_s21, 4  ;;  %s92_s22 = int_to_ptr.vmem [resolvable:$true] %s91_s22 }
  0x3b   :  { %s759_s2 = scalar_lea.vmem %s92_s22, 1024  ;;  %p764_p12 = scmp.lt.s32.totalorder %s92_s22, %s92_s22 }
  0x3c   :  { %p760_p11 = scmp.ne.s32.totalorder %s92_s22, %s759_s2  ;;  %p765_p13 = scmp.lt.s32.totalorder %s759_s2, %s759_s2 }
  0x3e   :  { %p766_p0 = por %p765_p13, %p764_p12 }
  0x40   :  { %p767_p1 = pnand %p766_p0, %p760_p11 }
  0x42   :  { %770 = shalt.err (!%p767_p1)
}
  0x43   :  { %97 = dma.hbm_to_vmem [thread:$0]  %s933_s8, 1024, %s92_s22, [#allocation12], %s808_s0, %s808_s0, %s809_s16  }
  0x44   :  { %791 = dma.done.wait [#allocation3], 256  }
  0x45   :  { %792 = vsyncadd [#allocation3], 4294967040 }
  0x46   :  { %793 = dma.done.wait [#allocation6], 768  }
  0x47   :  { %794 = vsyncadd [#allocation6], 4294966528 }
  0x48   :  { %795 = dma.done.wait [#allocation9], 1536  }
  0x49   :  { %796 = vsyncadd [#allocation9], 4294965760 }
  0x4a   :  { %797 = dma.done.wait [#allocation12], 1024  }
  0x4b   :  { %798 = vsyncadd [#allocation12], 4294966272  ;;  %v123_v0 = vld [vmem:[#allocation7 + $0x18] sm:$0xff]  ;;  %v122_v2 = vld [vmem:[#allocation7 + $0x10] sm:$0xff]  ;;  %vm131_vm0 = vcmask 261120   ;;  %v811_v28 = vmov 0.0   ;;  %v321_v43 = vlaneseq }
  0x4c   :  { %v220_v1 = vld [vmem:[#allocation8 + $0x18] sm:$0xff]  ;;  %588 = vmatprep.subr.mxu0 %v123_v0  ;;  %v219_v3 = vld [vmem:[#allocation8 + $0x10] sm:$0xff]  ;;  %v121_v4 = vld [vmem:[#allocation7 + $0x8] sm:$0xff]  ;;  %vm543_vm1 = vcmask 523264  }
  0x4d   :  { %599 = vmatprep.subr.mxu1 %v220_v1  ;;  %589 = vmatpush3.msra.mxu0 %v123_v0  ;;  %v218_v5 = vld [vmem:[#allocation8 + $0x8] sm:$0xff]  ;;  %v120_v6 = vld [vmem:[#allocation7] sm:$0xff]  ;;  %v215_v9 = vld [vmem:[#allocation5] sm:$0xff]  ;;  %v322_v44 = vshrl.u32 %v321_v43, 7 }
  0x4e   :  { %600 = vmatpush3.msra.mxu1 %v220_v1  ;;  %590 = vmatprep.subr.mxu0 %v122_v2  ;;  %v217_v7 = vld [vmem:[#allocation8] sm:$0xff]  ;;  %v119_v10 = vld [vmem:[#allocation2 + $0x8] sm:$0xff]  ;;  %v216_v11 = vld [vmem:[#allocation5 + $0x8] sm:$0xff] }
  0x4f   :  { %601 = vmatprep.subr.mxu1 %v219_v3  ;;  %591 = vmatpush3.msra.mxu0 %v122_v2  ;;  %v118_v8 = vld [vmem:[#allocation2] sm:$0xff]  ;;  %v318_v12 = vld [vmem:[#allocation10 + $0x38] sm:$0xff]  ;;  %v317_v14 = vld [vmem:[#allocation10 + $0x30] sm:$0xff]  ;;  %v323_v45 = vsub.s32 0, %v322_v44  ;;  %v327_v48 = vsub.s32 1, %v322_v44 }
  0x50   :  { %602 = vmatpush3.msra.mxu1 %v219_v3  ;;  %592 = vmatprep.subr.mxu0 %v121_v4  ;;  %v425_v13 = vld [vmem:[#allocation11 + $0x38] sm:$0xff]  ;;  %v424_v15 = vld [vmem:[#allocation11 + $0x30] sm:$0xff]  ;;  %v316_v16 = vld [vmem:[#allocation10 + $0x28] sm:$0xff] }
  0x51   :  { %603 = vmatprep.subr.mxu1 %v218_v5  ;;  %593 = vmatpush3.msra.mxu0 %v121_v4  ;;  %v423_v17 = vld [vmem:[#allocation11 + $0x28] sm:$0xff]  ;;  %v315_v18 = vld [vmem:[#allocation10 + $0x20] sm:$0xff]  ;;  %v314_v20 = vld [vmem:[#allocation10 + $0x18] sm:$0xff] }
  0x52   :  { %604 = vmatpush3.msra.mxu1 %v218_v5  ;;  %594 = vmatprep.subr.mxu0 %v120_v6  ;;  %v422_v19 = vld [vmem:[#allocation11 + $0x20] sm:$0xff]  ;;  %v421_v21 = vld [vmem:[#allocation11 + $0x18] sm:$0xff]  ;;  %v313_v22 = vld [vmem:[#allocation10 + $0x10] sm:$0xff] }
  0x53   :  { %605 = vmatprep.subr.mxu1 %v217_v7  ;;  %595 = vmatpush3.msra.mxu0 %v120_v6  ;;  %v420_v23 = vld [vmem:[#allocation11 + $0x10] sm:$0xff]  ;;  %v312_v24 = vld [vmem:[#allocation10 + $0x8] sm:$0xff]  ;;  %v311_v26 = vld [vmem:[#allocation10] sm:$0xff] }
  0x54   :  { %596 = vmatprep.mubr.msk.f32.mxu0 %vm131_vm0, %v118_v8  ;;  %606 = vmatpush3.msra.mxu1 %v217_v7  ;;  %v419_v25 = vld [vmem:[#allocation11 + $0x8] sm:$0xff]  ;;  %v418_v27 = vld [vmem:[#allocation11] sm:$0xff] }
  0x55   :  { %607 = vmatprep.mubr.msk.f32.mxu1 %vm131_vm0, %v215_v9  ;;  %597 = vmatmul.mubr.msk.f32.vlgmr.msra.gmra.mxu0 %vm131_vm0, %v119_v10  ;;  %v566_v31 = vld [vmem:[%s928_s3] ss:$0 sm:$0xff] }
  0x56   :  { %608 = vmatmul.mubr.msk.f32.vlgmr.msra.gmra.mxu1 %vm131_vm0, %v216_v11  ;;  %361 = vmatprep.subr.mxu0 %v318_v12  ;;  %v569_v32 = vld [vmem:[%s930_s5] ss:$0 sm:$0xff] }
  0x57   :  { %468 = vmatprep.subr.mxu1 %v425_v13  ;;  %362 = vmatpush1.msra.mxu0 %v317_v14  ;;  %v319_v46 = vld [vmem:[%s932_s7] sm:$0x3]  ;;  %s812_s7 = smov 64  }
  0x58   :  { %469 = vmatpush1.msra.mxu1 %v424_v15  ;;  %363 = vmatprep.subr.mxu0 %v316_v16  ;;  %v426_v47 = vld [vmem:[%s934_s9] sm:$0x3]  ;;  %v324_v49 = vrot.slane %v319_v46, %v323_v45  ;;  %v328_v51 = vrot.slane %v319_v46, %v327_v48  ;;  %s813_s9 = smov [#allocation13]  }
  0x59   :  { %470 = vmatprep.subr.mxu1 %v423_v17  ;;  %364 = vmatpush1.msra.mxu0 %v315_v18  ;;  %v431_v50 = vrot.slane %v426_v47, %v323_v45  ;;  %v435_v53 = vrot.slane %v426_v47, %v327_v48  ;;  %s551_s1 = sshll.u32 %s813_s9, 4  ;;  %s552_s1 = int_to_ptr.vmem [resolvable:$true] %s551_s1 }
  0x5a   :  { %471 = vmatpush1.msra.mxu1 %v422_v19  ;;  %365 = vmatprep.subr.mxu0 %v314_v20  ;;  %s771_s29 = scalar_lea.vmem %s552_s1, 256  ;;  %p776_p3 = scmp.lt.s32.totalorder %s552_s1, %s552_s1 }
  0x5b   :  { %472 = vmatprep.subr.mxu1 %v421_v21  ;;  %366 = vmatpush1.msra.mxu0 %v313_v22  ;;  %p772_p2 = scmp.ne.s32.totalorder %s552_s1, %s771_s29  ;;  %p777_p4 = scmp.lt.s32.totalorder %s771_s29, %s771_s29 }
  0x5c   :  { %473 = vmatpush1.msra.mxu1 %v420_v23  ;;  %367 = vmatprep.subr.mxu0 %v312_v24 }
  0x5d   :  { %474 = vmatprep.subr.mxu1 %v419_v25  ;;  %368 = vmatpush1.msra.mxu0 %v311_v26  ;;  %p778_p5 = por %p777_p4, %p776_p3 }
  0x5e   :  { %401 = vmatprep.mubr.f32.mxu0 %v811_v28  ;;  %475 = vmatpush1.msra.mxu1 %v418_v27 }
  0x5f   :  { %508 = vmatprep.mubr.f32.mxu1 %v811_v28  ;;  %p779_p6 = pnand %p778_p5, %p772_p2 }
 0x115   :  { %v598_v29 = vpop.f32.mrf.mxu0 }
 0x116   :  { %v609_v30 = vpop.f32.mrf.mxu1  ;;  %v210_v37 = vadd.f32 %v598_v29, %v566_v31 }
 0x117   :  { %v204_v33 = vpop.f32.mrf.mxu0  ;;  %v306_v38 = vadd.f32 %v609_v30, %v569_v32 }
 0x118   :  { %v300_v34 = vpop.f32.mrf.mxu1  ;;  %v205_v35 = vadd.f32 %v566_v31, %v204_v33 }
 0x119   :  { %v301_v36 = vadd.f32 %v569_v32, %v300_v34 }
 0x11a   :  { %623 = vtanh.f32 %v205_v35 }
 0x11b   :  { %625 = vtanh.f32 %v301_v36 }
 0x11c   :  { %627 = vtanh.f32 %v210_v37 }
 0x11d   :  { %629 = vtanh.f32 %v306_v38 }
 0x127   :  { %v624_v39 = vpop.eup %623 }
 0x128   :  { %v626_v40 = vpop.eup %625  ;;  %572 = vmatmul.mubr.msk.f32.vlgmr.msra.gmra.mxu0 %vm131_vm0, %v624_v39 }
 0x129   :  { %574 = vmatmul.mubr.msk.f32.vlgmr.msra.gmra.mxu1 %vm131_vm0, %v626_v40  ;;  %407 = vmatprep.mubr.f32.mxu0 %v811_v28  ;;  %v628_v41 = vpop.eup %627 }
 0x12a   :  { %514 = vmatprep.mubr.f32.mxu1 %v811_v28  ;;  %v630_v42 = vpop.eup %629 }
 0x12c   :  { %573 = vmatmul.mubr.msk.f32.gmra.mxu0 %vm131_vm0, %v628_v41 }
 0x12d   :  { %575 = vmatmul.mubr.msk.f32.gmra.mxu1 %vm131_vm0, %v630_v42 }
 0x1e8   :  { %v403_v52 = vpop.f32.mrf.mxu0 }
 0x1e9   :  { %v404_v54 = vadd.f32 %v403_v52, %v324_v49  ;;  %v510_v55 = vpop.f32.mrf.mxu1 }
 0x1ea   :  { %v511_v56 = vadd.f32 %v510_v55, %v431_v50  ;;  %v405_v57 = vpop.f32.mrf.mxu0 }
 0x1eb   :  { %631 = vtanh.f32 %v404_v54  ;;  %v406_v58 = vadd.f32 %v405_v57, %v328_v51  ;;  %v512_v59 = vpop.f32.mrf.mxu1 }
 0x1ec   :  { %633 = vtanh.f32 %v511_v56  ;;  %v513_v60 = vadd.f32 %v512_v59, %v435_v53  ;;  %v409_v61 = vpop.f32.mrf.mxu0 }
 0x1ed   :  { %635 = vtanh.f32 %v406_v58  ;;  %v410_v62 = vadd.f32 %v409_v61, %v324_v49  ;;  %v516_v63 = vpop.f32.mrf.mxu1 }
 0x1ee   :  { %637 = vtanh.f32 %v513_v60  ;;  %v517_v0 = vadd.f32 %v516_v63, %v431_v50  ;;  %v411_v10 = vpop.f32.mrf.mxu0 }
 0x1ef   :  { %639 = vtanh.f32 %v410_v62  ;;  %v518_v11 = vpop.f32.mrf.mxu1  ;;  %v412_v12 = vadd.f32 %v411_v10, %v328_v51 }
 0x1f0   :  { %641 = vtanh.f32 %v517_v0  ;;  %v519_v13 = vadd.f32 %v518_v11, %v435_v53 }
 0x1f1   :  { %643 = vtanh.f32 %v412_v12 }
 0x1f2   :  { %645 = vtanh.f32 %v519_v13 }
 0x1f8   :  { %v632_v1 = vpop.eup %631 }
 0x1f9   :  { %v634_v2 = vpop.eup %633 }
 0x1fa   :  { %v636_v3 = vpop.eup %635  ;;  %v525_v4 = vmul.f32 %v634_v2, %v632_v1 }
 0x1fb   :  { %v638_v5 = vpop.eup %637 }
 0x1fc   :  { %v640_v6 = vpop.eup %639  ;;  %531 = vrot.lane.b32.xlu0 %v525_v4, %s812_s7  ;;  %v526_v7 = vmul.f32 %v638_v5, %v636_v3 }
 0x1fd   :  { %v642_v8 = vpop.eup %641 }
 0x1fe   :  { %v527_v9 = vmul.f32 %v642_v8, %v640_v6  ;;  %v644_v15 = vpop.eup %643 }
 0x1ff   :  { %v646_v17 = vpop.eup %645 }
 0x200   :  { %533 = vrot.lane.b32.xlu0 %v527_v9, %s812_s7  ;;  %v528_v20 = vmul.f32 %v646_v17, %v644_v15 }
 0x26e   :  { %v532_v14 = vpop.permute.xlu0 %531 }
 0x26f   :  { %v537_v16 = vadd.f32 %v532_v14, %v525_v4 }
 0x271   :  { %v539_v18 = vadd.f32 %v537_v16, %v526_v7 }
 0x272   :  { %v534_v19 = vpop.permute.xlu0 %533 }
 0x273   :  { %647 = vtanh.f32 %v539_v18  ;;  %v538_v21 = vadd.f32 %v534_v19, %v527_v9 }
 0x275   :  { %v540_v22 = vadd.f32 %v538_v21, %v528_v20 }
 0x277   :  { %649 = vtanh.f32 %v540_v22 }
 0x280   :  { %v648_v23 = vpop.eup %647 }
 0x281   :  { %544 = vst.msk [vmem:[#allocation13] sm:$0xff] %vm543_vm1, %v648_v23 }
 0x284   :  { %v650_v24 = vpop.eup %649 }
 0x285   :  { %545 = vst.msk [vmem:[#allocation13 + $0x8] sm:$0xff] %vm543_vm1, %v650_v24 }
 0x286   :  { %782 = shalt.err (!%p779_p6)
}
 0x287   :  { %557 = dma.vmem_to_hbm [thread:$0]  %s552_s1, 256, %s935_s10, [#allocation4], %s803_s18, %s803_s18, %s804_s19  }
 0x288   :  { %799 = dma.done.wait [#allocation4], 256  }
 0x289   :  { %800 = vsyncadd [#allocation4], 4294967040 }
 0x28a   :  { %561 = vsyncpa [#allocation3], 1 }
 0x28b   :  { %562 = vsyncpa [#allocation6], 1 }
 0x28c   :  { %563 = vsyncpa [#allocation9], 1 }
 0x28d   :  { %564 = vsyncpa [#allocation12], 1 }
 0x28e   :  { %565 = vsyncpa [#allocation4], 1 }

</bundles_post_ra>
